<compile_context>
chip_gen: v7x
topology: tpu7x:2x2x1
jax: 0.10.0
libtpu: 0.0.40
codegen_flags: <defaults>
</compile_context>

<pallas_src>
import functools

import jax
import jax.numpy as jnp
from jax import lax
from jax.experimental import pallas as pl
from jax.experimental.pallas import tpu as pltpu


def _cfc_chunk_kernel(x_ref, wx_ref, wh_ref, b_ref, h_ref, xp_ref, *,
                      hp, b_pad, chunk, valid_last, unroll, mm_dtype):
    """One grid step == one chunk of `chunk` liquid (CfC) time steps.

    x_ref : (chunk*B_pad, F_in) raw inputs, time folded into the sublane dim
    wx_ref: (F_in, 4*Hp) input->gate weights (resident)
    wh_ref: (Hp, 4*Hp)   recurrent weights   (resident)
    b_ref : (1, 4*Hp)    bias                (resident)
    h_ref : (B_pad, Hp)  recurrent hidden state; constant-index output block => resident
            accumulator across the sequential grid, written back to HBM at the end.
    xp_ref: (chunk*B_pad, 4*Hp) f32 VMEM scratch for the chunk's pre-projected inputs.
    """
    c = pl.program_id(0)

    @pl.when(c == 0)
    def _():
        h_ref[...] = jnp.zeros_like(h_ref)

    # Chunk-level input projection: independent of h, so it sits off the serial chain.
    xp_ref[...] = (jnp.dot(x_ref[...], wx_ref[...],
                           preferred_element_type=jnp.float32)
                   + b_ref[...])

    wh = wh_ref[...]          # hoisted: loaded once per chunk

    def step(i, h):
        # Aligned sublane slice of this step's pre-projected input (b_pad % 8 == 0).
        row = pl.multiple_of(i * b_pad, b_pad)
        # Only the h-path matmul is on the serial dependency chain.
        pre = (jnp.dot(h.astype(mm_dtype), wh, preferred_element_type=jnp.float32)
               + xp_ref[pl.ds(row, b_pad), :])
        # Lane-aligned gate slices: each gate owns its own Hp-lane group.
        ff1 = jnp.tanh(pre[:, 0:hp])
        ff2 = jnp.tanh(pre[:, hp:2 * hp])
        # ts == 1.0 (CfC default elapsed time) => gate = sigmoid(time_a + time_b)
        g = jax.nn.sigmoid(pre[:, 2 * hp:3 * hp] + pre[:, 3 * hp:4 * hp])
        return ff1 * (1.0 - g) + g * ff2

    def run(n_steps, h0):
        return lax.fori_loop(0, n_steps, step, h0,
                             unroll=max(1, min(unroll, n_steps)))

    if valid_last == chunk:
        # T is a multiple of the time block: every chunk runs the full trip count.
        h_ref[...] = run(chunk, h_ref[...])
    else:
        last = pl.num_programs(0) - 1

        @pl.when(c < last)
        def _():
            h_ref[...] = run(chunk, h_ref[...])

        @pl.when(c == last)
        def _():
            # Padded tail chunk: static shorter trip count, no per-step masking anywhere.
            h_ref[...] = run(valid_last, h_ref[...])


def _auto_time_block(b_pad, hp, f_in, x_itemsize, budget_bytes=8 << 20):
    """Pick the largest time chunk that keeps VMEM use well under budget (all gens)."""
    per_step = b_pad * 4 * hp * 4 + 2 * b_pad * f_in * x_itemsize  # xp scratch + 2x x slab
    return int(max(8, min(256, budget_bytes // per_step)))


def liquid_nn_forward(x_btf, params, *, time_block=None, unroll=8,
                      matmul_dtype=jnp.float32):
    """x_btf: (B, T, F_in) float32 (batch_first, like the PyTorch module).

    Returns (y_final, h_final): the module's forward output (B, F_out) and the final
    hidden state (B, H) (stand-in for the store_hidden side-effect).
    """
    B, T, F_in = x_btf.shape
    H = params["wh"].shape[0]
    F_out = params["wlin"].shape[0]

    Hp = ((H + 127) // 128) * 128            # lane-aligned gate width
    B_pad = max(8, ((B + 7) // 8) * 8)       # sublane-aligned batch

    # Lane-aligned gate packing: each of the 4 CfC gates occupies its own Hp-lane group.
    # Padded weight columns / Wh rows / bias lanes are ZERO so padded h lanes stay 0.
    def pack_gates(w):
        parts = [w[..., k * H:(k + 1) * H] for k in range(4)]
        pad = [(0, 0)] * (w.ndim - 1) + [(0, Hp - H)]
        return jnp.concatenate([jnp.pad(p, pad) for p in parts], axis=-1)

    wx_p = pack_gates(params["wx"]).astype(matmul_dtype)                       # (F_in, 4Hp)
    wh_p = jnp.pad(pack_gates(params["wh"]),
                   ((0, Hp - H), (0, 0))).astype(matmul_dtype)                 # (Hp, 4Hp)
    b_p = pack_gates(params["b"]).astype(jnp.float32)                          # (1, 4Hp)

    if time_block is None:
        time_block = _auto_time_block(B_pad, Hp, F_in,
                                      jnp.dtype(matmul_dtype).itemsize)
    TB = max(1, min(int(time_block), T))
    n_chunks = pl.cdiv(T, TB)
    T_pad = n_chunks * TB
    valid_last = T - (n_chunks - 1) * TB     # static trip count of the tail chunk

    # Time-major, batch padded to a sublane multiple, time folded into the sublane dim.
    x_t = jnp.transpose(x_btf, (1, 0, 2))                                      # (T, B, F_in)
    x_t = jnp.pad(x_t, ((0, T_pad - T), (0, B_pad - B), (0, 0)))
    x_flat = x_t.reshape(T_pad * B_pad, F_in).astype(matmul_dtype)             # dense slab

    kernel = functools.partial(
        _cfc_chunk_kernel, hp=Hp, b_pad=B_pad, chunk=TB,
        valid_last=valid_last, unroll=unroll, mm_dtype=matmul_dtype)

    grid_spec = pltpu.PrefetchScalarGridSpec(
        num_scalar_prefetch=0,
        grid=(n_chunks,),
        in_specs=[
            pl.BlockSpec((TB * B_pad, F_in), lambda c: (c, 0)),   # raw x chunk (streamed)
            pl.BlockSpec((F_in, 4 * Hp), lambda c: (0, 0)),       # Wx (resident)
            pl.BlockSpec((Hp, 4 * Hp), lambda c: (0, 0)),         # Wh (resident)
            pl.BlockSpec((1, 4 * Hp), lambda c: (0, 0)),          # bias (resident)
        ],
        out_specs=pl.BlockSpec((B_pad, Hp), lambda c: (0, 0)),    # hidden state (resident)
        scratch_shapes=[pltpu.VMEM((TB * B_pad, 4 * Hp), jnp.float32)],
    )
    h_full = pl.pallas_call(
        kernel,
        grid_spec=grid_spec,
        out_shape=jax.ShapeDtypeStruct((B_pad, Hp), jnp.float32),
        compiler_params=pltpu.CompilerParams(
            # Recurrence over time => sequential grid axis.
            dimension_semantics=("arbitrary",)),
    )(x_flat, wx_p, wh_p, b_p)

    h_final = h_full[:B, :H]

    # NCP motor neurons, then out_layer.  AdaptiveAvgPool1d(F_out) over a length-F_out
    # axis is the identity, so out_layer reduces to the Linear; forward() keeps only the
    # last time step, which is exactly h_final's motor slice.
    y_final = h_final[:, :F_out] @ params["wlin"] + params["blin"]
    return y_final, h_final


def reference_forward(x_btf, params):
    """Pure-JAX reference of the same semantics (for correctness check)."""
    B, T, F_in = x_btf.shape
    H = params["wh"].shape[0]
    F_out = params["wlin"].shape[0]

    def step(h, x_t):
        pre = x_t @ params["wx"] + h @ params["wh"] + params["b"]
        ff1 = jnp.tanh(pre[:, :H])
        ff2 = jnp.tanh(pre[:, H:2 * H])
        g = jax.nn.sigmoid(pre[:, 2 * H:3 * H] + pre[:, 3 * H:4 * H])
        h_new = ff1 * (1.0 - g) + g * ff2
        return h_new, None

    h0 = jnp.zeros((B, H), jnp.float32)
    h_last, _ = jax.lax.scan(step, h0, jnp.transpose(x_btf, (1, 0, 2)))
    return h_last[:, :F_out] @ params["wlin"] + params["blin"], h_last


def init_params(key, in_features, n_neurons, out_features):
    H = n_neurons
    ks = jax.random.split(key, 5)
    scale = 1.0 / jnp.sqrt(jnp.float32(in_features + H))
    wx = jax.random.normal(ks[0], (in_features, 4 * H), jnp.float32) * scale
    wh = jax.random.normal(ks[1], (H, 4 * H), jnp.float32) * scale
    b = jax.random.normal(ks[2], (1, 4 * H), jnp.float32) * 0.1
    wlin = (jax.random.normal(ks[3], (out_features, out_features), jnp.float32)
            / jnp.sqrt(jnp.float32(out_features)))
    blin = jax.random.normal(ks[4], (1, out_features), jnp.float32) * 0.1
    return dict(wx=wx, wh=wh, b=b, wlin=wlin, blin=blin)


if __name__ == "__main__":
    B, T = 2, 8
    n_neurons, in_features, out_features = 32, 4, 8

    key = jax.random.PRNGKey(0)
    kx, kp = jax.random.split(key)
    x = jax.random.normal(kx, (B, T, in_features), jnp.float32)
    params = init_params(kp, in_features, n_neurons, out_features)

    y, h_final = liquid_nn_forward(x, params)            # auto (VMEM-budget) time block
    jax.block_until_ready(y)

    y_exp, h_exp = reference_forward(x, params)
    assert y.shape == (B, out_features)
    assert h_final.shape == (B, n_neurons)
    assert jnp.allclose(y, y_exp, atol=1e-3, rtol=1e-3), "mismatch vs reference (y)"
    assert jnp.allclose(h_final, h_exp, atol=1e-3, rtol=1e-3), "mismatch vs reference (h)"

    # Ragged-T path (T not a multiple of the time block => static-trip-count tail chunk).
    x2 = jax.random.normal(jax.random.PRNGKey(1), (B, 11, in_features), jnp.float32)
    y2, h2 = liquid_nn_forward(x2, params, time_block=4)
    jax.block_until_ready(y2)
    y2_exp, h2_exp = reference_forward(x2, params)
    assert jnp.allclose(y2, y2_exp, atol=1e-3, rtol=1e-3), "mismatch vs reference (ragged y)"
    assert jnp.allclose(h2, h2_exp, atol=1e-3, rtol=1e-3), "mismatch vs reference (ragged h)"

    print("KERNEL_OK")
</pallas_src>

<mosaic_0001>
module attributes {stable_mosaic.version = 11 : i64} {
  func.func @_cfc_chunk_kernel(%arg0: i32, %arg1: memref<64x4xf32, #tpu.memory_space<vmem>>, %arg2: memref<4x512xf32, #tpu.memory_space<vmem>>, %arg3: memref<128x512xf32, #tpu.memory_space<vmem>>, %arg4: memref<1x512xf32, #tpu.memory_space<vmem>>, %arg5: memref<8x128xf32, #tpu.memory_space<vmem>>, %arg6: memref<64x512xf32, #tpu.memory_space<vmem>>) attributes {dimension_semantics = [#tpu.dimension_semantics<arbitrary>], iteration_bounds = array<i64: 1>, scalar_prefetch = 0 : i64, scratch_operands = 1 : i64, tpu.core_type = #tpu.core_type<tc>, window_params = [{transform_indices = @transform_0, window_bounds = array<i64: 64, 4>}, {pipeline_mode = #tpu.pipeline_mode<synchronous>, transform_indices = @transform_1, window_bounds = array<i64: 4, 512>}, {pipeline_mode = #tpu.pipeline_mode<synchronous>, transform_indices = @transform_2, window_bounds = array<i64: 128, 512>}, {pipeline_mode = #tpu.pipeline_mode<synchronous>, transform_indices = @transform_3, window_bounds = array<i64: 1, 512>}, {pipeline_mode = #tpu.pipeline_mode<synchronous>, transform_indices = @transform_4, window_bounds = array<i64: 8, 128>}]} {
    %c0_i32 = arith.constant 0 : i32
    %0 = arith.cmpi eq, %arg0, %c0_i32 : i32
    %1 = arith.extui %0 : i1 to i32
    %c0_i32_0 = arith.constant 0 : i32
    %2 = arith.cmpi ne, %1, %c0_i32_0 : i32
    scf.if %2 {
      %cst_55 = arith.constant 0.000000e+00 : f32
      %197 = vector.broadcast %cst_55 : f32 to vector<8x128xf32>
      %c0_56 = arith.constant 0 : index
      %c0_57 = arith.constant 0 : index
      %198 = vector.load %arg5[%c0_56, %c0_57] : memref<8x128xf32, #tpu.memory_space<vmem>>, vector<8x128xf32>
      tpu.vector_store %arg5[%c0_56, %c0_57], %197 {strides = array<i32>} : memref<8x128xf32, #tpu.memory_space<vmem>>, vector<8x128xf32>,
    } else {
    }
    %c0 = arith.constant 0 : index
    %c0_1 = arith.constant 0 : index
    %3 = vector.load %arg1[%c0, %c0_1] : memref<64x4xf32, #tpu.memory_space<vmem>>, vector<64x4xf32>
    %c0_2 = arith.constant 0 : index
    %c0_3 = arith.constant 0 : index
    %4 = vector.load %arg2[%c0_2, %c0_3] : memref<4x512xf32, #tpu.memory_space<vmem>>, vector<4x512xf32>
    %cst = arith.constant dense<0.000000e+00> : vector<64x512xf32>
    %5 = tpu.matmul %3, %4, %cst {dimension_numbers = #tpu.dot_dimension_numbers<[1], [0], [0], [1], [0, 0, 1, 1], [], []>} : vector<64x4xf32>, vector<4x512xf32>, vector<64x512xf32> -> vector<64x512xf32>
    %c0_4 = arith.constant 0 : index
    %c0_5 = arith.constant 0 : index
    %6 = vector.load %arg4[%c0_4, %c0_5] : memref<1x512xf32, #tpu.memory_space<vmem>>, vector<1x512xf32>
    %7 = vector.broadcast %6 : vector<1x512xf32> to vector<64x512xf32>
    %8 = arith.addf %5, %7 : vector<64x512xf32>
    %c0_6 = arith.constant 0 : index
    %c0_7 = arith.constant 0 : index
    %9 = vector.load %arg6[%c0_6, %c0_7] : memref<64x512xf32, #tpu.memory_space<vmem>>, vector<64x512xf32>
    tpu.vector_store %arg6[%c0_6, %c0_7], %8 {strides = array<i32>} : memref<64x512xf32, #tpu.memory_space<vmem>>, vector<64x512xf32>,
    %c0_8 = arith.constant 0 : index
    %c0_9 = arith.constant 0 : index
    %10 = vector.load %arg3[%c0_8, %c0_9] : memref<128x512xf32, #tpu.memory_space<vmem>>, vector<128x512xf32>
    %c0_10 = arith.constant 0 : index
    %c0_11 = arith.constant 0 : index
    %11 = vector.load %arg5[%c0_10, %c0_11] : memref<8x128xf32, #tpu.memory_space<vmem>>, vector<8x128xf32>
    %c0_i32_12 = arith.constant 0 : i32
    %c8_i32 = arith.constant 8 : i32
    %12 = arith.muli %c0_i32_12, %c8_i32 : i32
    %13 = tpu.assume_multiple %12, 8 : i32
    %cst_13 = arith.constant dense<0.000000e+00> : vector<8x512xf32>
    %14 = tpu.matmul %11, %10, %cst_13 {dimension_numbers = #tpu.dot_dimension_numbers<[1], [0], [0], [1], [0, 0, 1, 1], [], []>} : vector<8x128xf32>, vector<128x512xf32>, vector<8x512xf32> -> vector<8x512xf32>
    %15 = arith.index_cast %13 : i32 to index
    %c0_14 = arith.constant 0 : index
    %16 = vector.load %arg6[%15, %c0_14] : memref<64x512xf32, #tpu.memory_space<vmem>>, vector<8x512xf32>
    %17 = arith.addf %14, %16 : vector<8x512xf32>
    %18 = vector.extract_strided_slice %17 {offsets = [0, 0], sizes = [8, 128], strides = [1, 1]} : vector<8x512xf32> to vector<8x128xf32>
    %19 = math.tanh %18 : vector<8x128xf32>
    %20 = vector.extract_strided_slice %17 {offsets = [0, 128], sizes = [8, 128], strides = [1, 1]} : vector<8x512xf32> to vector<8x128xf32>
    %21 = math.tanh %20 : vector<8x128xf32>
    %22 = vector.extract_strided_slice %17 {offsets = [0, 256], sizes = [8, 128], strides = [1, 1]} : vector<8x512xf32> to vector<8x128xf32>
    %23 = vector.extract_strided_slice %17 {offsets = [0, 384], sizes = [8, 128], strides = [1, 1]} : vector<8x512xf32> to vector<8x128xf32>
    %24 = arith.addf %22, %23 : vector<8x128xf32>
    %25 = arith.negf %24 : vector<8x128xf32>
    %26 = math.exp %25 : vector<8x128xf32>
    %cst_15 = arith.constant 1.000000e+00 : f32
    %27 = vector.broadcast %cst_15 : f32 to vector<8x128xf32>
    %28 = arith.addf %27, %26 : vector<8x128xf32>
    %29 = arith.divf %27, %28 : vector<8x128xf32>
    %cst_16 = arith.constant 1.000000e+00 : f32
    %30 = vector.broadcast %cst_16 : f32 to vector<8x128xf32>
    %31 = arith.subf %30, %29 : vector<8x128xf32>
    %32 = arith.mulf %19, %31 : vector<8x128xf32>
    %33 = arith.mulf %29, %21 : vector<8x128xf32>
    %34 = arith.addf %32, %33 : vector<8x128xf32>
    %c1_i32 = arith.constant 1 : i32
    %c8_i32_17 = arith.constant 8 : i32
    %35 = arith.muli %c1_i32, %c8_i32_17 : i32
    %36 = tpu.assume_multiple %35, 8 : i32
    %cst_18 = arith.constant dense<0.000000e+00> : vector<8x512xf32>
    %37 = tpu.matmul %34, %10, %cst_18 {dimension_numbers = #tpu.dot_dimension_numbers<[1], [0], [0], [1], [0, 0, 1, 1], [], []>} : vector<8x128xf32>, vector<128x512xf32>, vector<8x512xf32> -> vector<8x512xf32>
    %38 = arith.index_cast %36 : i32 to index
    %c0_19 = arith.constant 0 : index
    %39 = vector.load %arg6[%38, %c0_19] : memref<64x512xf32, #tpu.memory_space<vmem>>, vector<8x512xf32>
    %40 = arith.addf %37, %39 : vector<8x512xf32>
    %41 = vector.extract_strided_slice %40 {offsets = [0, 0], sizes = [8, 128], strides = [1, 1]} : vector<8x512xf32> to vector<8x128xf32>
    %42 = math.tanh %41 : vector<8x128xf32>
    %43 = vector.extract_strided_slice %40 {offsets = [0, 128], sizes = [8, 128], strides = [1, 1]} : vector<8x512xf32> to vector<8x128xf32>
    %44 = math.tanh %43 : vector<8x128xf32>
    %45 = vector.extract_strided_slice %40 {offsets = [0, 256], sizes = [8, 128], strides = [1, 1]} : vector<8x512xf32> to vector<8x128xf32>
    %46 = vector.extract_strided_slice %40 {offsets = [0, 384], sizes = [8, 128], strides = [1, 1]} : vector<8x512xf32> to vector<8x128xf32>
    %47 = arith.addf %45, %46 : vector<8x128xf32>
    %48 = arith.negf %47 : vector<8x128xf32>
    %49 = math.exp %48 : vector<8x128xf32>
    %cst_20 = arith.constant 1.000000e+00 : f32
    %50 = vector.broadcast %cst_20 : f32 to vector<8x128xf32>
    %51 = arith.addf %50, %49 : vector<8x128xf32>
    %52 = arith.divf %50, %51 : vector<8x128xf32>
    %cst_21 = arith.constant 1.000000e+00 : f32
    %53 = vector.broadcast %cst_21 : f32 to vector<8x128xf32>
    %54 = arith.subf %53, %52 : vector<8x128xf32>
    %55 = arith.mulf %42, %54 : vector<8x128xf32>
    %56 = arith.mulf %52, %44 : vector<8x128xf32>
    %57 = arith.addf %55, %56 : vector<8x128xf32>
    %c2_i32 = arith.constant 2 : i32
    %c8_i32_22 = arith.constant 8 : i32
    %58 = arith.muli %c2_i32, %c8_i32_22 : i32
    %59 = tpu.assume_multiple %58, 8 : i32
    %cst_23 = arith.constant dense<0.000000e+00> : vector<8x512xf32>
    %60 = tpu.matmul %57, %10, %cst_23 {dimension_numbers = #tpu.dot_dimension_numbers<[1], [0], [0], [1], [0, 0, 1, 1], [], []>} : vector<8x128xf32>, vector<128x512xf32>, vector<8x512xf32> -> vector<8x512xf32>
    %61 = arith.index_cast %59 : i32 to index
    %c0_24 = arith.constant 0 : index
    %62 = vector.load %arg6[%61, %c0_24] : memref<64x512xf32, #tpu.memory_space<vmem>>, vector<8x512xf32>
    %63 = arith.addf %60, %62 : vector<8x512xf32>
    %64 = vector.extract_strided_slice %63 {offsets = [0, 0], sizes = [8, 128], strides = [1, 1]} : vector<8x512xf32> to vector<8x128xf32>
    %65 = math.tanh %64 : vector<8x128xf32>
    %66 = vector.extract_strided_slice %63 {offsets = [0, 128], sizes = [8, 128], strides = [1, 1]} : vector<8x512xf32> to vector<8x128xf32>
    %67 = math.tanh %66 : vector<8x128xf32>
    %68 = vector.extract_strided_slice %63 {offsets = [0, 256], sizes = [8, 128], strides = [1, 1]} : vector<8x512xf32> to vector<8x128xf32>
    %69 = vector.extract_strided_slice %63 {offsets = [0, 384], sizes = [8, 128], strides = [1, 1]} : vector<8x512xf32> to vector<8x128xf32>
    %70 = arith.addf %68, %69 : vector<8x128xf32>
    %71 = arith.negf %70 : vector<8x128xf32>
    %72 = math.exp %71 : vector<8x128xf32>
    %cst_25 = arith.constant 1.000000e+00 : f32
    %73 = vector.broadcast %cst_25 : f32 to vector<8x128xf32>
    %74 = arith.addf %73, %72 : vector<8x128xf32>
    %75 = arith.divf %73, %74 : vector<8x128xf32>
    %cst_26 = arith.constant 1.000000e+00 : f32
    %76 = vector.broadcast %cst_26 : f32 to vector<8x128xf32>
    %77 = arith.subf %76, %75 : vector<8x128xf32>
    %78 = arith.mulf %65, %77 : vector<8x128xf32>
    %79 = arith.mulf %75, %67 : vector<8x128xf32>
    %80 = arith.addf %78, %79 : vector<8x128xf32>
    %c3_i32 = arith.constant 3 : i32
    %c8_i32_27 = arith.constant 8 : i32
    %81 = arith.muli %c3_i32, %c8_i32_27 : i32
    %82 = tpu.assume_multiple %81, 8 : i32
    %cst_28 = arith.constant dense<0.000000e+00> : vector<8x512xf32>
    %83 = tpu.matmul %80, %10, %cst_28 {dimension_numbers = #tpu.dot_dimension_numbers<[1], [0], [0], [1], [0, 0, 1, 1], [], []>} : vector<8x128xf32>, vector<128x512xf32>, vector<8x512xf32> -> vector<8x512xf32>
    %84 = arith.index_cast %82 : i32 to index
    %c0_29 = arith.constant 0 : index
    %85 = vector.load %arg6[%84, %c0_29] : memref<64x512xf32, #tpu.memory_space<vmem>>, vector<8x512xf32>
    %86 = arith.addf %83, %85 : vector<8x512xf32>
    %87 = vector.extract_strided_slice %86 {offsets = [0, 0], sizes = [8, 128], strides = [1, 1]} : vector<8x512xf32> to vector<8x128xf32>
    %88 = math.tanh %87 : vector<8x128xf32>
    %89 = vector.extract_strided_slice %86 {offsets = [0, 128], sizes = [8, 128], strides = [1, 1]} : vector<8x512xf32> to vector<8x128xf32>
    %90 = math.tanh %89 : vector<8x128xf32>
    %91 = vector.extract_strided_slice %86 {offsets = [0, 256], sizes = [8, 128], strides = [1, 1]} : vector<8x512xf32> to vector<8x128xf32>
    %92 = vector.extract_strided_slice %86 {offsets = [0, 384], sizes = [8, 128], strides = [1, 1]} : vector<8x512xf32> to vector<8x128xf32>
    %93 = arith.addf %91, %92 : vector<8x128xf32>
    %94 = arith.negf %93 : vector<8x128xf32>
    %95 = math.exp %94 : vector<8x128xf32>
    %cst_30 = arith.constant 1.000000e+00 : f32
    %96 = vector.broadcast %cst_30 : f32 to vector<8x128xf32>
    %97 = arith.addf %96, %95 : vector<8x128xf32>
    %98 = arith.divf %96, %97 : vector<8x128xf32>
    %cst_31 = arith.constant 1.000000e+00 : f32
    %99 = vector.broadcast %cst_31 : f32 to vector<8x128xf32>
    %100 = arith.subf %99, %98 : vector<8x128xf32>
    %101 = arith.mulf %88, %100 : vector<8x128xf32>
    %102 = arith.mulf %98, %90 : vector<8x128xf32>
    %103 = arith.addf %101, %102 : vector<8x128xf32>
    %c4_i32 = arith.constant 4 : i32
    %c8_i32_32 = arith.constant 8 : i32
    %104 = arith.muli %c4_i32, %c8_i32_32 : i32
    %105 = tpu.assume_multiple %104, 8 : i32
    %cst_33 = arith.constant dense<0.000000e+00> : vector<8x512xf32>
    %106 = tpu.matmul %103, %10, %cst_33 {dimension_numbers = #tpu.dot_dimension_numbers<[1], [0], [0], [1], [0, 0, 1, 1], [], []>} : vector<8x128xf32>, vector<128x512xf32>, vector<8x512xf32> -> vector<8x512xf32>
    %107 = arith.index_cast %105 : i32 to index
    %c0_34 = arith.constant 0 : index
    %108 = vector.load %arg6[%107, %c0_34] : memref<64x512xf32, #tpu.memory_space<vmem>>, vector<8x512xf32>
    %109 = arith.addf %106, %108 : vector<8x512xf32>
    %110 = vector.extract_strided_slice %109 {offsets = [0, 0], sizes = [8, 128], strides = [1, 1]} : vector<8x512xf32> to vector<8x128xf32>
    %111 = math.tanh %110 : vector<8x128xf32>
    %112 = vector.extract_strided_slice %109 {offsets = [0, 128], sizes = [8, 128], strides = [1, 1]} : vector<8x512xf32> to vector<8x128xf32>
    %113 = math.tanh %112 : vector<8x128xf32>
    %114 = vector.extract_strided_slice %109 {offsets = [0, 256], sizes = [8, 128], strides = [1, 1]} : vector<8x512xf32> to vector<8x128xf32>
    %115 = vector.extract_strided_slice %109 {offsets = [0, 384], sizes = [8, 128], strides = [1, 1]} : vector<8x512xf32> to vector<8x128xf32>
    %116 = arith.addf %114, %115 : vector<8x128xf32>
    %117 = arith.negf %116 : vector<8x128xf32>
    %118 = math.exp %117 : vector<8x128xf32>
    %cst_35 = arith.constant 1.000000e+00 : f32
    %119 = vector.broadcast %cst_35 : f32 to vector<8x128xf32>
    %120 = arith.addf %119, %118 : vector<8x128xf32>
    %121 = arith.divf %119, %120 : vector<8x128xf32>
    %cst_36 = arith.constant 1.000000e+00 : f32
    %122 = vector.broadcast %cst_36 : f32 to vector<8x128xf32>
    %123 = arith.subf %122, %121 : vector<8x128xf32>
    %124 = arith.mulf %111, %123 : vector<8x128xf32>
    %125 = arith.mulf %121, %113 : vector<8x128xf32>
    %126 = arith.addf %124, %125 : vector<8x128xf32>
    %c5_i32 = arith.constant 5 : i32
    %c8_i32_37 = arith.constant 8 : i32
    %127 = arith.muli %c5_i32, %c8_i32_37 : i32
    %128 = tpu.assume_multiple %127, 8 : i32
    %cst_38 = arith.constant dense<0.000000e+00> : vector<8x512xf32>
    %129 = tpu.matmul %126, %10, %cst_38 {dimension_numbers = #tpu.dot_dimension_numbers<[1], [0], [0], [1], [0, 0, 1, 1], [], []>} : vector<8x128xf32>, vector<128x512xf32>, vector<8x512xf32> -> vector<8x512xf32>
    %130 = arith.index_cast %128 : i32 to index
    %c0_39 = arith.constant 0 : index
    %131 = vector.load %arg6[%130, %c0_39] : memref<64x512xf32, #tpu.memory_space<vmem>>, vector<8x512xf32>
    %132 = arith.addf %129, %131 : vector<8x512xf32>
    %133 = vector.extract_strided_slice %132 {offsets = [0, 0], sizes = [8, 128], strides = [1, 1]} : vector<8x512xf32> to vector<8x128xf32>
    %134 = math.tanh %133 : vector<8x128xf32>
    %135 = vector.extract_strided_slice %132 {offsets = [0, 128], sizes = [8, 128], strides = [1, 1]} : vector<8x512xf32> to vector<8x128xf32>
    %136 = math.tanh %135 : vector<8x128xf32>
    %137 = vector.extract_strided_slice %132 {offsets = [0, 256], sizes = [8, 128], strides = [1, 1]} : vector<8x512xf32> to vector<8x128xf32>
    %138 = vector.extract_strided_slice %132 {offsets = [0, 384], sizes = [8, 128], strides = [1, 1]} : vector<8x512xf32> to vector<8x128xf32>
    %139 = arith.addf %137, %138 : vector<8x128xf32>
    %140 = arith.negf %139 : vector<8x128xf32>
    %141 = math.exp %140 : vector<8x128xf32>
    %cst_40 = arith.constant 1.000000e+00 : f32
    %142 = vector.broadcast %cst_40 : f32 to vector<8x128xf32>
    %143 = arith.addf %142, %141 : vector<8x128xf32>
    %144 = arith.divf %142, %143 : vector<8x128xf32>
    %cst_41 = arith.constant 1.000000e+00 : f32
    %145 = vector.broadcast %cst_41 : f32 to vector<8x128xf32>
    %146 = arith.subf %145, %144 : vector<8x128xf32>
    %147 = arith.mulf %134, %146 : vector<8x128xf32>
    %148 = arith.mulf %144, %136 : vector<8x128xf32>
    %149 = arith.addf %147, %148 : vector<8x128xf32>
    %c6_i32 = arith.constant 6 : i32
    %c8_i32_42 = arith.constant 8 : i32
    %150 = arith.muli %c6_i32, %c8_i32_42 : i32
    %151 = tpu.assume_multiple %150, 8 : i32
    %cst_43 = arith.constant dense<0.000000e+00> : vector<8x512xf32>
    %152 = tpu.matmul %149, %10, %cst_43 {dimension_numbers = #tpu.dot_dimension_numbers<[1], [0], [0], [1], [0, 0, 1, 1], [], []>} : vector<8x128xf32>, vector<128x512xf32>, vector<8x512xf32> -> vector<8x512xf32>
    %153 = arith.index_cast %151 : i32 to index
    %c0_44 = arith.constant 0 : index
    %154 = vector.load %arg6[%153, %c0_44] : memref<64x512xf32, #tpu.memory_space<vmem>>, vector<8x512xf32>
    %155 = arith.addf %152, %154 : vector<8x512xf32>
    %156 = vector.extract_strided_slice %155 {offsets = [0, 0], sizes = [8, 128], strides = [1, 1]} : vector<8x512xf32> to vector<8x128xf32>
    %157 = math.tanh %156 : vector<8x128xf32>
    %158 = vector.extract_strided_slice %155 {offsets = [0, 128], sizes = [8, 128], strides = [1, 1]} : vector<8x512xf32> to vector<8x128xf32>
    %159 = math.tanh %158 : vector<8x128xf32>
    %160 = vector.extract_strided_slice %155 {offsets = [0, 256], sizes = [8, 128], strides = [1, 1]} : vector<8x512xf32> to vector<8x128xf32>
    %161 = vector.extract_strided_slice %155 {offsets = [0, 384], sizes = [8, 128], strides = [1, 1]} : vector<8x512xf32> to vector<8x128xf32>
    %162 = arith.addf %160, %161 : vector<8x128xf32>
    %163 = arith.negf %162 : vector<8x128xf32>
    %164 = math.exp %163 : vector<8x128xf32>
    %cst_45 = arith.constant 1.000000e+00 : f32
    %165 = vector.broadcast %cst_45 : f32 to vector<8x128xf32>
    %166 = arith.addf %165, %164 : vector<8x128xf32>
    %167 = arith.divf %165, %166 : vector<8x128xf32>
    %cst_46 = arith.constant 1.000000e+00 : f32
    %168 = vector.broadcast %cst_46 : f32 to vector<8x128xf32>
    %169 = arith.subf %168, %167 : vector<8x128xf32>
    %170 = arith.mulf %157, %169 : vector<8x128xf32>
    %171 = arith.mulf %167, %159 : vector<8x128xf32>
    %172 = arith.addf %170, %171 : vector<8x128xf32>
    %c7_i32 = arith.constant 7 : i32
    %c8_i32_47 = arith.constant 8 : i32
    %173 = arith.muli %c7_i32, %c8_i32_47 : i32
    %174 = tpu.assume_multiple %173, 8 : i32
    %cst_48 = arith.constant dense<0.000000e+00> : vector<8x512xf32>
    %175 = tpu.matmul %172, %10, %cst_48 {dimension_numbers = #tpu.dot_dimension_numbers<[1], [0], [0], [1], [0, 0, 1, 1], [], []>} : vector<8x128xf32>, vector<128x512xf32>, vector<8x512xf32> -> vector<8x512xf32>
    %176 = arith.index_cast %174 : i32 to index
    %c0_49 = arith.constant 0 : index
    %177 = vector.load %arg6[%176, %c0_49] : memref<64x512xf32, #tpu.memory_space<vmem>>, vector<8x512xf32>
    %178 = arith.addf %175, %177 : vector<8x512xf32>
    %179 = vector.extract_strided_slice %178 {offsets = [0, 0], sizes = [8, 128], strides = [1, 1]} : vector<8x512xf32> to vector<8x128xf32>
    %180 = math.tanh %179 : vector<8x128xf32>
    %181 = vector.extract_strided_slice %178 {offsets = [0, 128], sizes = [8, 128], strides = [1, 1]} : vector<8x512xf32> to vector<8x128xf32>
    %182 = math.tanh %181 : vector<8x128xf32>
    %183 = vector.extract_strided_slice %178 {offsets = [0, 256], sizes = [8, 128], strides = [1, 1]} : vector<8x512xf32> to vector<8x128xf32>
    %184 = vector.extract_strided_slice %178 {offsets = [0, 384], sizes = [8, 128], strides = [1, 1]} : vector<8x512xf32> to vector<8x128xf32>
    %185 = arith.addf %183, %184 : vector<8x128xf32>
    %186 = arith.negf %185 : vector<8x128xf32>
    %187 = math.exp %186 : vector<8x128xf32>
    %cst_50 = arith.constant 1.000000e+00 : f32
    %188 = vector.broadcast %cst_50 : f32 to vector<8x128xf32>
    %189 = arith.addf %188, %187 : vector<8x128xf32>
    %190 = arith.divf %188, %189 : vector<8x128xf32>
    %cst_51 = arith.constant 1.000000e+00 : f32
    %191 = vector.broadcast %cst_51 : f32 to vector<8x128xf32>
    %192 = arith.subf %191, %190 : vector<8x128xf32>
    %193 = arith.mulf %180, %192 : vector<8x128xf32>
    %194 = arith.mulf %190, %182 : vector<8x128xf32>
    %195 = arith.addf %193, %194 : vector<8x128xf32>
    %c8_i32_52 = arith.constant 8 : i32
    %c0_53 = arith.constant 0 : index
    %c0_54 = arith.constant 0 : index
    %196 = vector.load %arg5[%c0_53, %c0_54] : memref<8x128xf32, #tpu.memory_space<vmem>>, vector<8x128xf32>
    tpu.vector_store %arg5[%c0_53, %c0_54], %195 {strides = array<i32>} : memref<8x128xf32, #tpu.memory_space<vmem>>, vector<8x128xf32>,
    return
  }
  func.func @transform_0(%arg0: i32) -> (i32, i32) {
    %c0_i32 = arith.constant 0 : i32
    %c0_i32_0 = arith.constant 0 : i32
    return %arg0, %c0_i32 : i32, i32
  }
  func.func @transform_1(%arg0: i32) -> (i32, i32) {
    %c0_i32 = arith.constant 0 : i32
    %c0_i32_0 = arith.constant 0 : i32
    %c0_i32_1 = arith.constant 0 : i32
    return %c0_i32, %c0_i32_0 : i32, i32
  }
  func.func @transform_2(%arg0: i32) -> (i32, i32) {
    %c0_i32 = arith.constant 0 : i32
    %c0_i32_0 = arith.constant 0 : i32
    %c0_i32_1 = arith.constant 0 : i32
    return %c0_i32, %c0_i32_0 : i32, i32
  }
  func.func @transform_3(%arg0: i32) -> (i32, i32) {
    %c0_i32 = arith.constant 0 : i32
    %c0_i32_0 = arith.constant 0 : i32
    %c0_i32_1 = arith.constant 0 : i32
    return %c0_i32, %c0_i32_0 : i32, i32
  }
  func.func @transform_4(%arg0: i32) -> (i32, i32) {
    %c0_i32 = arith.constant 0 : i32
    %c0_i32_0 = arith.constant 0 : i32
    %c0_i32_1 = arith.constant 0 : i32
    return %c0_i32, %c0_i32_0 : i32, i32
  }
}

</mosaic_0001>

<bundles_post_ra>
// kernel: tpu_custom_call.1
= control target key start
LH: loop header
LB: loop body
LE: loop exit
PB: predicated region body
PF: predicated region fallthrough
CT: control target
= control target key end

     0   :  { %9 = vsyncpa [#allocation4], 0  ;;  %s2973_s0 = inlined_call_operand.vmem [shape: f32[64,4], index: 0, kind: input, shape index: {}]   ;;  %s2974_s1 = inlined_call_operand.vmem [shape: f32[4,512], index: 1, kind: input, shape index: {}]   ;;  %s2975_s2 = inlined_call_operand.hbm [shape: f32[128,512], index: 2, kind: input, shape index: {}]   ;;  %s2976_s3 = inlined_call_operand.vmem [shape: f32[1,512], index: 3, kind: input, shape index: {}]   ;;  %s2977_s4 = inlined_call_operand.hbm [shape: f32[8,128], index: 4, kind: output, shape index: {}]  }
   0x1   :  { %10 = vsyncpa [#allocation5], 0  ;;  %s2472_s15 = smov [#allocation3]   ;;  %s2424_s19 = scalar_lea.hbm %s2975_s2, 8192 }
   0x2   :  { %s20_s16 = sshll.u32 %s2472_s15, 4  ;;  %p2425_p0 = scmp.ne.s32.totalorder %s2975_s2, %s2424_s19  ;;  %s21_s16 = int_to_ptr.vmem [resolvable:$true] %s20_s16 }
   0x3   :  { %p2428_p1 = scmp.lt.u32.totalorder %s2424_s19, %s2975_s2 }
   0x5   :  { %p2430_p2 = pnand %p2428_p1, %p2425_p0 }
   0x7   :  { %2433 = shalt.err (!%p2430_p2)
}
   0x8   :  { %s2434_s24 = scalar_lea.vmem %s21_s16, 8192  ;;  %p2439_p4 = scmp.lt.s32.totalorder %s21_s16, %s21_s16 }
   0x9   :  { %p2435_p3 = scmp.ne.s32.totalorder %s21_s16, %s2434_s24  ;;  %p2440_p5 = scmp.lt.s32.totalorder %s2434_s24, %s2434_s24 }
   0xb   :  { %p2441_p6 = por %p2440_p5, %p2439_p4 }
   0xd   :  { %p2442_p7 = pnand %p2441_p6, %p2435_p3 }
   0xf   :  { %2445 = shalt.err (!%p2442_p7)
}
  0x10   :  { %s2473_s25 = smov 512   ;;  %s2474_s26 = smov 32  }
  0x11   :  { %26 = dma.hbm_to_vmem [thread:$0]  %s2975_s2, 8192, %s21_s16, [#allocation4], %s2473_s25, %s2473_s25, %s2474_s26  }
  0x12   :  { %2468 = dma.done.wait [#allocation4], 8192  }
  0x13   :  { %2469 = vsyncadd [#allocation4], 4294959104  ;;  %v2475_v0 = vmov 0.0   ;;  %v45_v1 = vld [vmem:[%s2974_s1] sm:$0xff]  ;;  %vm98_vm0 = vcmask 1043456   ;;  %v46_v2 = vld [vmem:[%s2974_s1 + $0x8] sm:$0xff] }
  0x14   :  { %171 = vmatprep.mubr.f32.mxu0 %v2475_v0  ;;  %284 = vmatprep.mubr.f32.mxu1 %v2475_v0  ;;  %v37_v3 = vld [vmem:[%s2973_s0] sm:$0xff]  ;;  %v71_v4 = vcombine.high %v45_v1, %v45_v1  ;;  %v72_v5 = vcombine.high %v46_v2, %v46_v2  ;;  %v368_v8 = vld [vmem:[#allocation3 + $0x18] sm:$0xff]  ;;  %vm73_vm1 = vcmask 31744   ;;  %v365_v11 = vld [vmem:[#allocation3] sm:$0xff] }
  0x15   :  { %v366_v6 = vld [vmem:[#allocation3 + $0x8] sm:$0xff]  ;;  %v372_v10 = vld [vmem:[#allocation3 + $0x38] sm:$0xff]  ;;  %v369_v12 = vld [vmem:[#allocation3 + $0x20] sm:$0xff] }
  0x16   :  { %v370_v7 = vld [vmem:[#allocation3 + $0x28] sm:$0xff]  ;;  %1749 = vmatprep.subr.msk.mxu0 %vm98_vm0, %v71_v4  ;;  %1759 = vmatprep.subr.msk.mxu1 %vm98_vm0, %v72_v5  ;;  %v2529_v13 = vpack.c.bf16 %v372_v10, %v368_v8  ;;  %v2531_v14 = vpack.c.bf16 %v369_v12, %v365_v11  ;;  %v367_v15 = vld [vmem:[#allocation3 + $0x10] sm:$0xff]  ;;  %v376_v20 = vld [vmem:[#allocation3 + $0x58] sm:$0xff] }
  0x17   :  { %v2525_v9 = vpack.c.bf16 %v370_v7, %v366_v6  ;;  %v371_v16 = vld [vmem:[#allocation3 + $0x30] sm:$0xff]  ;;  %1750 = vmatpush1.msk.msra.mxu0 %vm98_vm0, %v45_v1  ;;  %1760 = vmatpush1.msk.msra.mxu1 %vm98_vm0, %v46_v2  ;;  %v374_v18 = vld [vmem:[#allocation3 + $0x48] sm:$0xff]  ;;  %v380_v21 = vld [vmem:[#allocation3 + $0x78] sm:$0xff] }
  0x18   :  { %v2535_v17 = vpack.c.bf16 %v371_v16, %v367_v15  ;;  %v378_v19 = vld [vmem:[#allocation3 + $0x68] sm:$0xff]  ;;  %1751 = vmatmul.mubr.msk.f32.vlgmr.msra.gmra.mrb[0].mxu0 %vm73_vm1, %v37_v3  ;;  %1761 = vmatmul.mubr.msk.f32.vlgmr.msra.gmra.mrb[0].mxu1 %vm73_vm1, %v37_v3  ;;  %v373_v22 = vld [vmem:[#allocation3 + $0x40] sm:$0xff]  ;;  %v38_v24 = vld [vmem:[%s2973_s0 + $0x8] sm:$0xff]  ;;  %v2546_v26 = vpack.c.bf16 %v380_v21, %v376_v20 }
  0x19   :  { %v377_v23 = vld [vmem:[#allocation3 + $0x60] sm:$0xff]  ;;  %1778 = vmatprep.subr.bf16.mxu0 %v2525_v9  ;;  %1810 = vmatprep.subr.bf16.mxu1 %v2529_v13  ;;  %v2544_v25 = vpack.c.bf16 %v378_v19, %v374_v18  ;;  %v375_v27 = vld [vmem:[#allocation3 + $0x50] sm:$0xff]  ;;  %v382_v31 = vld [vmem:[#allocation3 + $0x88] sm:$0xff] }
  0x1a   :  { %v379_v28 = vld [vmem:[#allocation3 + $0x70] sm:$0xff]  ;;  %1780 = vmatpush1.bf16.msra.mxu0 %v2531_v14  ;;  %1812 = vmatpush1.bf16.msra.mxu1 %v2535_v17  ;;  %v2550_v29 = vpack.c.bf16 %v377_v23, %v373_v22  ;;  %v386_v32 = vld [vmem:[#allocation3 + $0xa8] sm:$0xff]  ;;  %v384_v33 = vld [vmem:[#allocation3 + $0x98] sm:$0xff] }
  0x1b   :  { %v2552_v30 = vpack.c.bf16 %v379_v28, %v375_v27  ;;  %177 = vmatprep.mubr.f32.mxu0 %v2475_v0  ;;  %290 = vmatprep.mubr.f32.mxu1 %v2475_v0  ;;  %v388_v34 = vld [vmem:[#allocation3 + $0xb8] sm:$0xff]  ;;  %v381_v35 = vld [vmem:[#allocation3 + $0x80] sm:$0xff]  ;;  %v383_v37 = vld [vmem:[#allocation3 + $0x90] sm:$0xff]  ;;  %v2563_v40 = vpack.c.bf16 %v386_v32, %v382_v31 }
  0x1c   :  { %v385_v36 = vld [vmem:[#allocation3 + $0xa0] sm:$0xff]  ;;  %1752 = vmatmul.mubr.msk.f32.gmra.mrb[2].mxu0 %vm73_vm1, %v38_v24  ;;  %1762 = vmatmul.mubr.msk.f32.gmra.mrb[2].mxu1 %vm73_vm1, %v38_v24  ;;  %v387_v38 = vld [vmem:[#allocation3 + $0xb0] sm:$0xff]  ;;  %v39_v39 = vld [vmem:[%s2973_s0 + $0x10] sm:$0xff]  ;;  %v2565_v41 = vpack.c.bf16 %v388_v34, %v384_v33 }
  0x1d   :  { %1782 = vmatprep.subr.bf16.mxu0 %v2544_v25  ;;  %1814 = vmatprep.subr.bf16.mxu1 %v2546_v26  ;;  %v390_v42 = vld [vmem:[#allocation3 + $0xc8] sm:$0xff]  ;;  %v2569_v44 = vpack.c.bf16 %v385_v36, %v381_v35  ;;  %v2571_v45 = vpack.c.bf16 %v387_v38, %v383_v37  ;;  %v392_v46 = vld [vmem:[#allocation3 + $0xd8] sm:$0xff]  ;;  %v389_v48 = vld [vmem:[#allocation3 + $0xc0] sm:$0xff] }
  0x1e   :  { %v394_v43 = vld [vmem:[#allocation3 + $0xe8] sm:$0xff]  ;;  %1784 = vmatpush1.bf16.msra.mxu0 %v2550_v29  ;;  %1816 = vmatpush1.bf16.msra.mxu1 %v2552_v30  ;;  %v396_v47 = vld [vmem:[#allocation3 + $0xf8] sm:$0xff]  ;;  %v393_v49 = vld [vmem:[#allocation3 + $0xe0] sm:$0xff] }
  0x1f   :  { %183 = vmatprep.mubr.f32.mxu0 %v2475_v0  ;;  %296 = vmatprep.mubr.f32.mxu1 %v2475_v0  ;;  %v391_v50 = vld [vmem:[#allocation3 + $0xd0] sm:$0xff]  ;;  %v40_v52 = vld [vmem:[%s2973_s0 + $0x18] sm:$0xff]  ;;  %v2582_v53 = vpack.c.bf16 %v394_v43, %v390_v42  ;;  %v2584_v54 = vpack.c.bf16 %v396_v47, %v392_v46  ;;  %v398_v55 = vld [vmem:[#allocation3 + $0x108] sm:$0xff]  ;;  %v2588_v57 = vpack.c.bf16 %v393_v49, %v389_v48 }
  0x20   :  { %v395_v51 = vld [vmem:[#allocation3 + $0xf0] sm:$0xff]  ;;  %1753 = vmatmul.mubr.msk.f32.gmra.mrb[4].mxu0 %vm73_vm1, %v39_v39  ;;  %1763 = vmatmul.mubr.msk.f32.gmra.mrb[4].mxu1 %vm73_vm1, %v39_v39  ;;  %v402_v56 = vld [vmem:[#allocation3 + $0x128] sm:$0xff]  ;;  %v400_v59 = vld [vmem:[#allocation3 + $0x118] sm:$0xff] }
  0x21   :  { %1786 = vmatprep.subr.bf16.mxu0 %v2563_v40  ;;  %1818 = vmatprep.subr.bf16.mxu1 %v2565_v41  ;;  %v2590_v58 = vpack.c.bf16 %v395_v51, %v391_v50  ;;  %v404_v60 = vld [vmem:[#allocation3 + $0x138] sm:$0xff]  ;;  %v397_v61 = vld [vmem:[#allocation3 + $0x100] sm:$0xff]  ;;  %v399_v63 = vld [vmem:[#allocation3 + $0x110] sm:$0xff]  ;;  %v2601_v3 = vpack.c.bf16 %v402_v56, %v398_v55 }
  0x22   :  { %1788 = vmatpush1.bf16.msra.mxu0 %v2569_v44  ;;  %1820 = vmatpush1.bf16.msra.mxu1 %v2571_v45  ;;  %v401_v62 = vld [vmem:[#allocation3 + $0x120] sm:$0xff]  ;;  %v403_v1 = vld [vmem:[#allocation3 + $0x130] sm:$0xff]  ;;  %v41_v2 = vld [vmem:[%s2973_s0 + $0x20] sm:$0xff]  ;;  %v2603_v4 = vpack.c.bf16 %v404_v60, %v400_v59 }
  0x23   :  { %189 = vmatprep.mubr.f32.mxu0 %v2475_v0  ;;  %302 = vmatprep.mubr.f32.mxu1 %v2475_v0  ;;  %v406_v5 = vld [vmem:[#allocation3 + $0x148] sm:$0xff]  ;;  %v2607_v7 = vpack.c.bf16 %v401_v62, %v397_v61  ;;  %v2609_v8 = vpack.c.bf16 %v403_v1, %v399_v63  ;;  %v408_v10 = vld [vmem:[#allocation3 + $0x158] sm:$0xff]  ;;  %v405_v12 = vld [vmem:[#allocation3 + $0x140] sm:$0xff]  ;;  %v49_v62 = vlaneseq }
  0x24   :  { %1754 = vmatmul.mubr.msk.f32.gmra.mrb[6].mxu0 %vm73_vm1, %v40_v52  ;;  %1764 = vmatmul.mubr.msk.f32.gmra.mrb[6].mxu1 %vm73_vm1, %v40_v52  ;;  %v410_v6 = vld [vmem:[#allocation3 + $0x168] sm:$0xff]  ;;  %v412_v11 = vld [vmem:[#allocation3 + $0x178] sm:$0xff]  ;;  %v409_v15 = vld [vmem:[#allocation3 + $0x160] sm:$0xff] }
  0x25   :  { %1790 = vmatprep.subr.bf16.mxu0 %v2582_v53  ;;  %1822 = vmatprep.subr.bf16.mxu1 %v2584_v54  ;;  %v407_v16 = vld [vmem:[#allocation3 + $0x150] sm:$0xff]  ;;  %v2620_v20 = vpack.c.bf16 %v410_v6, %v406_v5  ;;  %v2622_v21 = vpack.c.bf16 %v412_v11, %v408_v10  ;;  %v414_v22 = vld [vmem:[#allocation3 + $0x188] sm:$0xff]  ;;  %v2626_v24 = vpack.c.bf16 %v409_v15, %v405_v12  ;;  %v416_v28 = vld [vmem:[#allocation3 + $0x198] sm:$0xff]  ;;  %v50_v63 = vshrl.u32 %v49_v62, 7 }
  0x26   :  { %1792 = vmatpush1.bf16.msra.mxu0 %v2588_v57  ;;  %1824 = vmatpush1.bf16.msra.mxu1 %v2590_v58  ;;  %v411_v18 = vld [vmem:[#allocation3 + $0x170] sm:$0xff]  ;;  %v418_v23 = vld [vmem:[#allocation3 + $0x1a8] sm:$0xff]  ;;  %v420_v31 = vld [vmem:[#allocation3 + $0x1b8] sm:$0xff] }
  0x27   :  { %195 = vmatprep.mubr.f32.mxu0 %v2475_v0  ;;  %308 = vmatprep.mubr.f32.mxu1 %v2475_v0  ;;  %v42_v19 = vld [vmem:[%s2973_s0 + $0x28] sm:$0xff]  ;;  %v2628_v27 = vpack.c.bf16 %v411_v18, %v407_v16  ;;  %v413_v32 = vld [vmem:[#allocation3 + $0x180] sm:$0xff]  ;;  %v43_v36 = vld [vmem:[%s2973_s0 + $0x30] sm:$0xff]  ;;  %v2639_v37 = vpack.c.bf16 %v418_v23, %v414_v22  ;;  %v2641_v38 = vpack.c.bf16 %v420_v31, %v416_v28  ;;  %v59_v1 = vsub.s32 2, %v50_v63 }
  0x28   :  { %1755 = vmatmul.mubr.msk.f32.gmra.mrb[8].mxu0 %vm73_vm1, %v41_v2  ;;  %1765 = vmatmul.mubr.msk.f32.gmra.mrb[8].mxu1 %vm73_vm1, %v41_v2  ;;  %v417_v33 = vld [vmem:[#allocation3 + $0x1a0] sm:$0xff]  ;;  %v415_v34 = vld [vmem:[#allocation3 + $0x190] sm:$0xff]  ;;  %v422_v39 = vld [vmem:[#allocation3 + $0x1c8] sm:$0xff]  ;;  %v63_v5 = vsub.s32 3, %v50_v63  ;;  %v55_v28 = vsub.s32 1, %v50_v63  ;;  %v51_v31 = vsub.s32 0, %v50_v63 }
  0x29   :  { %1794 = vmatprep.subr.bf16.mxu0 %v2601_v3  ;;  %1826 = vmatprep.subr.bf16.mxu1 %v2603_v4  ;;  %v419_v35 = vld [vmem:[#allocation3 + $0x1b0] sm:$0xff]  ;;  %v426_v42 = vld [vmem:[#allocation3 + $0x1e8] sm:$0xff]  ;;  %v2645_v43 = vpack.c.bf16 %v417_v33, %v413_v32  ;;  %v424_v47 = vld [vmem:[#allocation3 + $0x1d8] sm:$0xff] }
  0x2a   :  { %1796 = vmatpush1.bf16.msra.mxu0 %v2607_v7  ;;  %1828 = vmatpush1.bf16.msra.mxu1 %v2609_v8  ;;  %v2647_v46 = vpack.c.bf16 %v419_v35, %v415_v34  ;;  %v428_v48 = vld [vmem:[#allocation3 + $0x1f8] sm:$0xff]  ;;  %v421_v49 = vld [vmem:[#allocation3 + $0x1c0] sm:$0xff]  ;;  %v423_v51 = vld [vmem:[#allocation3 + $0x1d0] sm:$0xff]  ;;  %v2658_v56 = vpack.c.bf16 %v426_v42, %v422_v39 }
  0x2b   :  { %201 = vmatprep.mubr.f32.mxu0 %v2475_v0  ;;  %314 = vmatprep.mubr.f32.mxu1 %v2475_v0  ;;  %v425_v50 = vld [vmem:[#allocation3 + $0x1e0] sm:$0xff]  ;;  %v427_v52 = vld [vmem:[#allocation3 + $0x1f0] sm:$0xff]  ;;  %v2660_v59 = vpack.c.bf16 %v428_v48, %v424_v47  ;;  %v47_v2 = vld [vmem:[%s2976_s3] sm:$0xf]  ;;  %s2476_s3 = smov [#allocation6]  }
  0x2c   :  { %1756 = vmatmul.mubr.msk.f32.gmra.mrb[10].mxu0 %vm73_vm1, %v42_v19  ;;  %1766 = vmatmul.mubr.msk.f32.gmra.mrb[10].mxu1 %vm73_vm1, %v42_v19  ;;  %v44_v55 = vld [vmem:[%s2973_s0 + $0x38] sm:$0xff]  ;;  %v2664_v60 = vpack.c.bf16 %v425_v50, %v421_v49  ;;  %v2666_v61 = vpack.c.bf16 %v427_v52, %v423_v51  ;;  %v2719_v6 = vrot.slane %v47_v2, %v59_v1  ;;  %s1733_s22 = sshll.u32 %s2476_s3, 4  ;;  %s1734_s22 = int_to_ptr.vmem [resolvable:$true] %s1733_s22 }
  0x2d   :  { %1798 = vmatprep.subr.bf16.mxu0 %v2620_v20  ;;  %1830 = vmatprep.subr.bf16.mxu1 %v2622_v21  ;;  %v2721_v10 = vrot.slane %v47_v2, %v63_v5  ;;  %v2725_v32 = vrot.slane %v47_v2, %v55_v28  ;;  %v2727_v33 = vrot.slane %v47_v2, %v51_v31  ;;  %s2446_s23 = scalar_lea.vmem %s1734_s22, 128  ;;  %p2451_p9 = scmp.lt.s32.totalorder %s1734_s22, %s1734_s22 }
  0x2e   :  { %1800 = vmatpush1.bf16.msra.mxu0 %v2626_v24  ;;  %1832 = vmatpush1.bf16.msra.mxu1 %v2628_v27  ;;  %p2447_p8 = scmp.ne.s32.totalorder %s1734_s22, %s2446_s23  ;;  %p2452_p10 = scmp.lt.s32.totalorder %s2446_s23, %s2446_s23 }
  0x2f   :  { %207 = vmatprep.mubr.f32.mxu0 %v2475_v0  ;;  %320 = vmatprep.mubr.f32.mxu1 %v2475_v0 }
  0x30   :  { %1757 = vmatmul.mubr.msk.f32.gmra.mrb[12].mxu0 %vm73_vm1, %v43_v36  ;;  %1767 = vmatmul.mubr.msk.f32.gmra.mrb[12].mxu1 %vm73_vm1, %v43_v36  ;;  %p2453_p11 = por %p2452_p10, %p2451_p9 }
  0x31   :  { %1802 = vmatprep.subr.bf16.mxu0 %v2639_v37  ;;  %1834 = vmatprep.subr.bf16.mxu1 %v2641_v38 }
  0x32   :  { %1804 = vmatpush1.bf16.msra.mxu0 %v2645_v43  ;;  %1836 = vmatpush1.bf16.msra.mxu1 %v2647_v46  ;;  %p2454_p12 = pnand %p2453_p11, %p2447_p8 }
  0x33   :  { %213 = vmatprep.mubr.f32.mxu0 %v2475_v0  ;;  %326 = vmatprep.mubr.f32.mxu1 %v2475_v0 }
  0x34   :  { %1758 = vmatmul.mubr.msk.f32.gmra.mrb[14].mxu0 %vm73_vm1, %v44_v55  ;;  %1768 = vmatmul.mubr.msk.f32.gmra.mrb[14].mxu1 %vm73_vm1, %v44_v55 }
  0x35   :  { %1806 = vmatprep.subr.bf16.mxu0 %v2658_v56  ;;  %1838 = vmatprep.subr.bf16.mxu1 %v2660_v59 }
  0x36   :  { %1808 = vmatpush1.bf16.msra.mxu0 %v2664_v60  ;;  %1840 = vmatpush1.bf16.msra.mxu1 %v2666_v61 }
  0x37   :  { %501 = vmatprep.mubr.f32.mxu0 %v2475_v0  ;;  %572 = vmatprep.mubr.f32.mxu1 %v2475_v0 }
  0x38   :  { %1842 = vmatprep.subr.bf16.mxu0 %v2525_v9  ;;  %1874 = vmatprep.subr.bf16.mxu1 %v2529_v13 }
  0x39   :  { %502 = vmatmul.mubr.f32.vlgmr.msra.gmra.mrb[0].mxu0 %v2475_v0  ;;  %573 = vmatmul.mubr.f32.vlgmr.msra.gmra.mrb[0].mxu1 %v2475_v0 }
  0x3a   :  { %1844 = vmatpush1.bf16.msra.mxu0 %v2531_v14  ;;  %1876 = vmatpush1.bf16.msra.mxu1 %v2535_v17 }
  0x3b   :  { %1846 = vmatprep.subr.bf16.mxu0 %v2544_v25  ;;  %1878 = vmatprep.subr.bf16.mxu1 %v2546_v26 }
  0x3c   :  { %663 = vmatprep.mubr.f32.mxu0 %v2475_v0  ;;  %734 = vmatprep.mubr.f32.mxu1 %v2475_v0 }
  0x3e   :  { %1848 = vmatpush1.bf16.msra.mxu0 %v2550_v29  ;;  %1880 = vmatpush1.bf16.msra.mxu1 %v2552_v30 }
  0x3f   :  { %1850 = vmatprep.subr.bf16.mxu0 %v2563_v40  ;;  %1882 = vmatprep.subr.bf16.mxu1 %v2565_v41 }
  0x42   :  { %1852 = vmatpush1.bf16.msra.mxu0 %v2569_v44  ;;  %1884 = vmatpush1.bf16.msra.mxu1 %v2571_v45 }
  0x43   :  { %1854 = vmatprep.subr.bf16.mxu0 %v2582_v53  ;;  %1886 = vmatprep.subr.bf16.mxu1 %v2584_v54 }
  0x46   :  { %1856 = vmatpush1.bf16.msra.mxu0 %v2588_v57  ;;  %1888 = vmatpush1.bf16.msra.mxu1 %v2590_v58 }
  0x47   :  { %1858 = vmatprep.subr.bf16.mxu0 %v2601_v3  ;;  %1890 = vmatprep.subr.bf16.mxu1 %v2603_v4 }
  0x4a   :  { %1860 = vmatpush1.bf16.msra.mxu0 %v2607_v7  ;;  %1892 = vmatpush1.bf16.msra.mxu1 %v2609_v8 }
  0x4b   :  { %1862 = vmatprep.subr.bf16.mxu0 %v2620_v20  ;;  %1894 = vmatprep.subr.bf16.mxu1 %v2622_v21 }
  0x4e   :  { %1864 = vmatpush1.bf16.msra.mxu0 %v2626_v24  ;;  %1896 = vmatpush1.bf16.msra.mxu1 %v2628_v27 }
  0x4f   :  { %1866 = vmatprep.subr.bf16.mxu0 %v2639_v37  ;;  %1898 = vmatprep.subr.bf16.mxu1 %v2641_v38 }
  0x52   :  { %1868 = vmatpush1.bf16.msra.mxu0 %v2645_v43  ;;  %1900 = vmatpush1.bf16.msra.mxu1 %v2647_v46 }
  0x53   :  { %1870 = vmatprep.subr.bf16.mxu0 %v2658_v56  ;;  %1902 = vmatprep.subr.bf16.mxu1 %v2660_v59 }
  0x56   :  { %1872 = vmatpush1.bf16.msra.mxu0 %v2664_v60  ;;  %1904 = vmatpush1.bf16.msra.mxu1 %v2666_v61 }
  0x57   :  { %1906 = vmatprep.subr.bf16.mxu0 %v2525_v9  ;;  %1938 = vmatprep.subr.bf16.mxu1 %v2529_v13 }
 0x10c   :  { %v503_v11 = vpop.f32.mrb[0].mxu0  ;;  %v574_v12 = vpop.f32.mrb[0].mxu1 }
 0x10d   :  { %v2305_v15 = vadd.f32 %v574_v12, %v2719_v6  ;;  %v505_v16 = vpop.f32.mrb[1].mxu0  ;;  %v576_v18 = vpop.f32.mrb[1].mxu1  ;;  %v2289_v36 = vadd.f32 %v503_v11, %v2727_v33 }
 0x10e   :  { %v2306_v19 = vadd.f32 %v576_v18, %v2721_v10  ;;  %v2290_v34 = vadd.f32 %v505_v16, %v2725_v32 }
 0x110   :  { %v581_v22 = vadd.f32 %v2306_v19, %v2305_v15 }
 0x112   :  { %v1769_v23 = vmul.f32 -1.442695, %v581_v22 }
 0x114   :  { %2360 = vpow2.f32 %v1769_v23 }
 0x115   :  { %2362 = vtanh.f32 %v2290_v34 }
 0x11e   :  { %v2361_v35 = vpop.eup %2360 }
 0x11f   :  { %v585_v39 = vadd.f32 1.0, %v2361_v35  ;;  %v2363_v42 = vpop.eup %2362 }
 0x121   :  { %2364 = vrcp.f32 %v585_v39 }
 0x122   :  { %2366 = vtanh.f32 %v2289_v36 }
 0x12b   :  { %v2365_v47 = vpop.eup %2364 }
 0x12c   :  { %v588_v48 = vsub.f32 1.0, %v2365_v47  ;;  %v590_v49 = vmul.f32 %v2365_v47, %v2363_v42  ;;  %v2367_v50 = vpop.eup %2366 }
 0x12e   :  { %v589_v51 = vmul.f32 %v2367_v50, %v588_v48 }
 0x130   :  { %v591_v52 = vadd.f32 %v590_v49, %v589_v51 }
 0x132   :  { %664 = vmatmul.mubr.f32.vlgmr.msra.gmra.mrb[2].mxu0 %v591_v52  ;;  %735 = vmatmul.mubr.f32.vlgmr.msra.gmra.mrb[2].mxu1 %v591_v52 }
 0x133   :  { %1908 = vmatpush1.bf16.msra.mxu0 %v2531_v14  ;;  %1940 = vmatpush1.bf16.msra.mxu1 %v2535_v17 }
 0x134   :  { %1910 = vmatprep.subr.bf16.mxu0 %v2544_v25  ;;  %1942 = vmatprep.subr.bf16.mxu1 %v2546_v26 }
 0x135   :  { %825 = vmatprep.mubr.f32.mxu0 %v2475_v0  ;;  %896 = vmatprep.mubr.f32.mxu1 %v2475_v0 }
 0x137   :  { %1912 = vmatpush1.bf16.msra.mxu0 %v2550_v29  ;;  %1944 = vmatpush1.bf16.msra.mxu1 %v2552_v30 }
 0x138   :  { %1914 = vmatprep.subr.bf16.mxu0 %v2563_v40  ;;  %1946 = vmatprep.subr.bf16.mxu1 %v2565_v41 }
 0x13b   :  { %1916 = vmatpush1.bf16.msra.mxu0 %v2569_v44  ;;  %1948 = vmatpush1.bf16.msra.mxu1 %v2571_v45 }
 0x13c   :  { %1918 = vmatprep.subr.bf16.mxu0 %v2582_v53  ;;  %1950 = vmatprep.subr.bf16.mxu1 %v2584_v54 }
 0x13f   :  { %1920 = vmatpush1.bf16.msra.mxu0 %v2588_v57  ;;  %1952 = vmatpush1.bf16.msra.mxu1 %v2590_v58 }
 0x140   :  { %1922 = vmatprep.subr.bf16.mxu0 %v2601_v3  ;;  %1954 = vmatprep.subr.bf16.mxu1 %v2603_v4 }
 0x143   :  { %1924 = vmatpush1.bf16.msra.mxu0 %v2607_v7  ;;  %1956 = vmatpush1.bf16.msra.mxu1 %v2609_v8 }
 0x144   :  { %1926 = vmatprep.subr.bf16.mxu0 %v2620_v20  ;;  %1958 = vmatprep.subr.bf16.mxu1 %v2622_v21 }
 0x147   :  { %1928 = vmatpush1.bf16.msra.mxu0 %v2626_v24  ;;  %1960 = vmatpush1.bf16.msra.mxu1 %v2628_v27 }
 0x148   :  { %1930 = vmatprep.subr.bf16.mxu0 %v2639_v37  ;;  %1962 = vmatprep.subr.bf16.mxu1 %v2641_v38 }
 0x14b   :  { %1932 = vmatpush1.bf16.msra.mxu0 %v2645_v43  ;;  %1964 = vmatpush1.bf16.msra.mxu1 %v2647_v46 }
 0x14c   :  { %1934 = vmatprep.subr.bf16.mxu0 %v2658_v56  ;;  %1966 = vmatprep.subr.bf16.mxu1 %v2660_v59 }
 0x14f   :  { %1936 = vmatpush1.bf16.msra.mxu0 %v2664_v60  ;;  %1968 = vmatpush1.bf16.msra.mxu1 %v2666_v61 }
 0x150   :  { %1970 = vmatprep.subr.bf16.mxu0 %v2525_v9  ;;  %2002 = vmatprep.subr.bf16.mxu1 %v2529_v13 }
 0x205   :  { %v665_v55 = vpop.f32.mrb[2].mxu0  ;;  %v736_v62 = vpop.f32.mrb[2].mxu1 }
 0x206   :  { %v2307_v63 = vadd.f32 %v736_v62, %v2719_v6  ;;  %v667_v1 = vpop.f32.mrb[3].mxu0  ;;  %v738_v2 = vpop.f32.mrb[3].mxu1  ;;  %v2291_v18 = vadd.f32 %v665_v55, %v2727_v33 }
 0x207   :  { %v2308_v5 = vadd.f32 %v738_v2, %v2721_v10  ;;  %v2292_v15 = vadd.f32 %v667_v1, %v2725_v32 }
 0x209   :  { %v743_v11 = vadd.f32 %v2308_v5, %v2307_v63 }
 0x20b   :  { %v1770_v12 = vmul.f32 -1.442695, %v743_v11 }
 0x20d   :  { %2368 = vpow2.f32 %v1770_v12 }
 0x20e   :  { %2370 = vtanh.f32 %v2292_v15 }
 0x217   :  { %v2369_v16 = vpop.eup %2368 }
 0x218   :  { %v747_v19 = vadd.f32 1.0, %v2369_v16  ;;  %v2371_v22 = vpop.eup %2370 }
 0x21a   :  { %2372 = vrcp.f32 %v747_v19 }
 0x21b   :  { %2374 = vtanh.f32 %v2291_v18 }
 0x224   :  { %v2373_v23 = vpop.eup %2372 }
 0x225   :  { %v750_v28 = vsub.f32 1.0, %v2373_v23  ;;  %v752_v31 = vmul.f32 %v2373_v23, %v2371_v22  ;;  %v2375_v34 = vpop.eup %2374 }
 0x227   :  { %v751_v35 = vmul.f32 %v2375_v34, %v750_v28 }
 0x229   :  { %v753_v36 = vadd.f32 %v752_v31, %v751_v35 }
 0x22b   :  { %826 = vmatmul.mubr.f32.vlgmr.msra.gmra.mrb[4].mxu0 %v753_v36  ;;  %897 = vmatmul.mubr.f32.vlgmr.msra.gmra.mrb[4].mxu1 %v753_v36 }
 0x22c   :  { %1972 = vmatpush1.bf16.msra.mxu0 %v2531_v14  ;;  %2004 = vmatpush1.bf16.msra.mxu1 %v2535_v17 }
 0x22d   :  { %1974 = vmatprep.subr.bf16.mxu0 %v2544_v25  ;;  %2006 = vmatprep.subr.bf16.mxu1 %v2546_v26 }
 0x22e   :  { %987 = vmatprep.mubr.f32.mxu0 %v2475_v0  ;;  %1058 = vmatprep.mubr.f32.mxu1 %v2475_v0 }
 0x230   :  { %1976 = vmatpush1.bf16.msra.mxu0 %v2550_v29  ;;  %2008 = vmatpush1.bf16.msra.mxu1 %v2552_v30 }
 0x231   :  { %1978 = vmatprep.subr.bf16.mxu0 %v2563_v40  ;;  %2010 = vmatprep.subr.bf16.mxu1 %v2565_v41 }
 0x234   :  { %1980 = vmatpush1.bf16.msra.mxu0 %v2569_v44  ;;  %2012 = vmatpush1.bf16.msra.mxu1 %v2571_v45 }
 0x235   :  { %1982 = vmatprep.subr.bf16.mxu0 %v2582_v53  ;;  %2014 = vmatprep.subr.bf16.mxu1 %v2584_v54 }
 0x238   :  { %1984 = vmatpush1.bf16.msra.mxu0 %v2588_v57  ;;  %2016 = vmatpush1.bf16.msra.mxu1 %v2590_v58 }
 0x239   :  { %1986 = vmatprep.subr.bf16.mxu0 %v2601_v3  ;;  %2018 = vmatprep.subr.bf16.mxu1 %v2603_v4 }
 0x23c   :  { %1988 = vmatpush1.bf16.msra.mxu0 %v2607_v7  ;;  %2020 = vmatpush1.bf16.msra.mxu1 %v2609_v8 }
 0x23d   :  { %1990 = vmatprep.subr.bf16.mxu0 %v2620_v20  ;;  %2022 = vmatprep.subr.bf16.mxu1 %v2622_v21 }
 0x240   :  { %1992 = vmatpush1.bf16.msra.mxu0 %v2626_v24  ;;  %2024 = vmatpush1.bf16.msra.mxu1 %v2628_v27 }
 0x241   :  { %1994 = vmatprep.subr.bf16.mxu0 %v2639_v37  ;;  %2026 = vmatprep.subr.bf16.mxu1 %v2641_v38 }
 0x244   :  { %1996 = vmatpush1.bf16.msra.mxu0 %v2645_v43  ;;  %2028 = vmatpush1.bf16.msra.mxu1 %v2647_v46 }
 0x245   :  { %1998 = vmatprep.subr.bf16.mxu0 %v2658_v56  ;;  %2030 = vmatprep.subr.bf16.mxu1 %v2660_v59 }
 0x248   :  { %2000 = vmatpush1.bf16.msra.mxu0 %v2664_v60  ;;  %2032 = vmatpush1.bf16.msra.mxu1 %v2666_v61 }
 0x249   :  { %2034 = vmatprep.subr.bf16.mxu0 %v2525_v9  ;;  %2066 = vmatprep.subr.bf16.mxu1 %v2529_v13 }
 0x2fe   :  { %v827_v39 = vpop.f32.mrb[4].mxu0  ;;  %v898_v42 = vpop.f32.mrb[4].mxu1 }
 0x2ff   :  { %v2309_v47 = vadd.f32 %v898_v42, %v2719_v6  ;;  %v829_v48 = vpop.f32.mrb[5].mxu0  ;;  %v900_v49 = vpop.f32.mrb[5].mxu1  ;;  %v2293_v63 = vadd.f32 %v827_v39, %v2727_v33 }
 0x300   :  { %v2310_v50 = vadd.f32 %v900_v49, %v2721_v10  ;;  %v2294_v55 = vadd.f32 %v829_v48, %v2725_v32 }
 0x302   :  { %v905_v51 = vadd.f32 %v2310_v50, %v2309_v47 }
 0x304   :  { %v1771_v52 = vmul.f32 -1.442695, %v905_v51 }
 0x306   :  { %2376 = vpow2.f32 %v1771_v52 }
 0x307   :  { %2378 = vtanh.f32 %v2294_v55 }
 0x310   :  { %v2377_v62 = vpop.eup %2376 }
 0x311   :  { %v909_v1 = vadd.f32 1.0, %v2377_v62  ;;  %v2379_v2 = vpop.eup %2378 }
 0x313   :  { %2380 = vrcp.f32 %v909_v1 }
 0x314   :  { %2382 = vtanh.f32 %v2293_v63 }
 0x31d   :  { %v2381_v5 = vpop.eup %2380 }
 0x31e   :  { %v912_v11 = vsub.f32 1.0, %v2381_v5  ;;  %v914_v12 = vmul.f32 %v2381_v5, %v2379_v2  ;;  %v2383_v15 = vpop.eup %2382 }
 0x320   :  { %v913_v16 = vmul.f32 %v2383_v15, %v912_v11 }
 0x322   :  { %v915_v18 = vadd.f32 %v914_v12, %v913_v16 }
 0x324   :  { %988 = vmatmul.mubr.f32.vlgmr.msra.gmra.mrb[6].mxu0 %v915_v18  ;;  %1059 = vmatmul.mubr.f32.vlgmr.msra.gmra.mrb[6].mxu1 %v915_v18 }
 0x325   :  { %2036 = vmatpush1.bf16.msra.mxu0 %v2531_v14  ;;  %2068 = vmatpush1.bf16.msra.mxu1 %v2535_v17 }
 0x326   :  { %2038 = vmatprep.subr.bf16.mxu0 %v2544_v25  ;;  %2070 = vmatprep.subr.bf16.mxu1 %v2546_v26 }
 0x327   :  { %1149 = vmatprep.mubr.f32.mxu0 %v2475_v0  ;;  %1220 = vmatprep.mubr.f32.mxu1 %v2475_v0 }
 0x329   :  { %2040 = vmatpush1.bf16.msra.mxu0 %v2550_v29  ;;  %2072 = vmatpush1.bf16.msra.mxu1 %v2552_v30 }
 0x32a   :  { %2042 = vmatprep.subr.bf16.mxu0 %v2563_v40  ;;  %2074 = vmatprep.subr.bf16.mxu1 %v2565_v41 }
 0x32d   :  { %2044 = vmatpush1.bf16.msra.mxu0 %v2569_v44  ;;  %2076 = vmatpush1.bf16.msra.mxu1 %v2571_v45 }
 0x32e   :  { %2046 = vmatprep.subr.bf16.mxu0 %v2582_v53  ;;  %2078 = vmatprep.subr.bf16.mxu1 %v2584_v54 }
 0x331   :  { %2048 = vmatpush1.bf16.msra.mxu0 %v2588_v57  ;;  %2080 = vmatpush1.bf16.msra.mxu1 %v2590_v58 }
 0x332   :  { %2050 = vmatprep.subr.bf16.mxu0 %v2601_v3  ;;  %2082 = vmatprep.subr.bf16.mxu1 %v2603_v4 }
 0x335   :  { %2052 = vmatpush1.bf16.msra.mxu0 %v2607_v7  ;;  %2084 = vmatpush1.bf16.msra.mxu1 %v2609_v8 }
 0x336   :  { %2054 = vmatprep.subr.bf16.mxu0 %v2620_v20  ;;  %2086 = vmatprep.subr.bf16.mxu1 %v2622_v21 }
 0x339   :  { %2056 = vmatpush1.bf16.msra.mxu0 %v2626_v24  ;;  %2088 = vmatpush1.bf16.msra.mxu1 %v2628_v27 }
 0x33a   :  { %2058 = vmatprep.subr.bf16.mxu0 %v2639_v37  ;;  %2090 = vmatprep.subr.bf16.mxu1 %v2641_v38 }
 0x33d   :  { %2060 = vmatpush1.bf16.msra.mxu0 %v2645_v43  ;;  %2092 = vmatpush1.bf16.msra.mxu1 %v2647_v46 }
 0x33e   :  { %2062 = vmatprep.subr.bf16.mxu0 %v2658_v56  ;;  %2094 = vmatprep.subr.bf16.mxu1 %v2660_v59 }
 0x341   :  { %2064 = vmatpush1.bf16.msra.mxu0 %v2664_v60  ;;  %2096 = vmatpush1.bf16.msra.mxu1 %v2666_v61 }
 0x342   :  { %2098 = vmatprep.subr.bf16.mxu0 %v2525_v9  ;;  %2130 = vmatprep.subr.bf16.mxu1 %v2529_v13 }
 0x3f7   :  { %v989_v19 = vpop.f32.mrb[6].mxu0  ;;  %v1060_v22 = vpop.f32.mrb[6].mxu1 }
 0x3f8   :  { %v2311_v23 = vadd.f32 %v1060_v22, %v2719_v6  ;;  %v991_v28 = vpop.f32.mrb[7].mxu0  ;;  %v1062_v31 = vpop.f32.mrb[7].mxu1  ;;  %v2295_v47 = vadd.f32 %v989_v19, %v2727_v33 }
 0x3f9   :  { %v2312_v34 = vadd.f32 %v1062_v31, %v2721_v10  ;;  %v2296_v39 = vadd.f32 %v991_v28, %v2725_v32 }
 0x3fb   :  { %v1067_v35 = vadd.f32 %v2312_v34, %v2311_v23 }
 0x3fd   :  { %v1772_v36 = vmul.f32 -1.442695, %v1067_v35 }
 0x3ff   :  { %2384 = vpow2.f32 %v1772_v36 }
 0x400   :  { %2386 = vtanh.f32 %v2296_v39 }
 0x409   :  { %v2385_v42 = vpop.eup %2384 }
 0x40a   :  { %v1071_v48 = vadd.f32 1.0, %v2385_v42  ;;  %v2387_v49 = vpop.eup %2386 }
 0x40c   :  { %2388 = vrcp.f32 %v1071_v48 }
 0x40d   :  { %2390 = vtanh.f32 %v2295_v47 }
 0x416   :  { %v2389_v50 = vpop.eup %2388 }
 0x417   :  { %v1074_v51 = vsub.f32 1.0, %v2389_v50  ;;  %v1076_v52 = vmul.f32 %v2389_v50, %v2387_v49  ;;  %v2391_v55 = vpop.eup %2390 }
 0x419   :  { %v1075_v62 = vmul.f32 %v2391_v55, %v1074_v51 }
 0x41b   :  { %v1077_v63 = vadd.f32 %v1076_v52, %v1075_v62 }
 0x41d   :  { %1150 = vmatmul.mubr.f32.vlgmr.msra.gmra.mrb[8].mxu0 %v1077_v63  ;;  %1221 = vmatmul.mubr.f32.vlgmr.msra.gmra.mrb[8].mxu1 %v1077_v63 }
 0x41e   :  { %2100 = vmatpush1.bf16.msra.mxu0 %v2531_v14  ;;  %2132 = vmatpush1.bf16.msra.mxu1 %v2535_v17 }
 0x41f   :  { %2102 = vmatprep.subr.bf16.mxu0 %v2544_v25  ;;  %2134 = vmatprep.subr.bf16.mxu1 %v2546_v26 }
 0x420   :  { %1311 = vmatprep.mubr.f32.mxu0 %v2475_v0  ;;  %1382 = vmatprep.mubr.f32.mxu1 %v2475_v0 }
 0x422   :  { %2104 = vmatpush1.bf16.msra.mxu0 %v2550_v29  ;;  %2136 = vmatpush1.bf16.msra.mxu1 %v2552_v30 }
 0x423   :  { %2106 = vmatprep.subr.bf16.mxu0 %v2563_v40  ;;  %2138 = vmatprep.subr.bf16.mxu1 %v2565_v41 }
 0x426   :  { %2108 = vmatpush1.bf16.msra.mxu0 %v2569_v44  ;;  %2140 = vmatpush1.bf16.msra.mxu1 %v2571_v45 }
 0x427   :  { %2110 = vmatprep.subr.bf16.mxu0 %v2582_v53  ;;  %2142 = vmatprep.subr.bf16.mxu1 %v2584_v54 }
 0x42a   :  { %2112 = vmatpush1.bf16.msra.mxu0 %v2588_v57  ;;  %2144 = vmatpush1.bf16.msra.mxu1 %v2590_v58 }
 0x42b   :  { %2114 = vmatprep.subr.bf16.mxu0 %v2601_v3  ;;  %2146 = vmatprep.subr.bf16.mxu1 %v2603_v4 }
 0x42e   :  { %2116 = vmatpush1.bf16.msra.mxu0 %v2607_v7  ;;  %2148 = vmatpush1.bf16.msra.mxu1 %v2609_v8 }
 0x42f   :  { %2118 = vmatprep.subr.bf16.mxu0 %v2620_v20  ;;  %2150 = vmatprep.subr.bf16.mxu1 %v2622_v21 }
 0x432   :  { %2120 = vmatpush1.bf16.msra.mxu0 %v2626_v24  ;;  %2152 = vmatpush1.bf16.msra.mxu1 %v2628_v27 }
 0x433   :  { %2122 = vmatprep.subr.bf16.mxu0 %v2639_v37  ;;  %2154 = vmatprep.subr.bf16.mxu1 %v2641_v38 }
 0x436   :  { %2124 = vmatpush1.bf16.msra.mxu0 %v2645_v43  ;;  %2156 = vmatpush1.bf16.msra.mxu1 %v2647_v46 }
 0x437   :  { %2126 = vmatprep.subr.bf16.mxu0 %v2658_v56  ;;  %2158 = vmatprep.subr.bf16.mxu1 %v2660_v59 }
 0x43a   :  { %2128 = vmatpush1.bf16.msra.mxu0 %v2664_v60  ;;  %2160 = vmatpush1.bf16.msra.mxu1 %v2666_v61 }
 0x43b   :  { %2162 = vmatprep.subr.bf16.mxu0 %v2525_v9  ;;  %2194 = vmatprep.subr.bf16.mxu1 %v2529_v13 }
 0x4f0   :  { %v1151_v1 = vpop.f32.mrb[8].mxu0  ;;  %v1222_v2 = vpop.f32.mrb[8].mxu1 }
 0x4f1   :  { %v2313_v5 = vadd.f32 %v1222_v2, %v2719_v6  ;;  %v1153_v11 = vpop.f32.mrb[9].mxu0  ;;  %v1224_v12 = vpop.f32.mrb[9].mxu1  ;;  %v2297_v23 = vadd.f32 %v1151_v1, %v2727_v33 }
 0x4f2   :  { %v2314_v15 = vadd.f32 %v1224_v12, %v2721_v10  ;;  %v2298_v19 = vadd.f32 %v1153_v11, %v2725_v32 }
 0x4f4   :  { %v1229_v16 = vadd.f32 %v2314_v15, %v2313_v5 }
 0x4f6   :  { %v1773_v18 = vmul.f32 -1.442695, %v1229_v16 }
 0x4f8   :  { %2392 = vpow2.f32 %v1773_v18 }
 0x4f9   :  { %2394 = vtanh.f32 %v2298_v19 }
 0x502   :  { %v2393_v22 = vpop.eup %2392 }
 0x503   :  { %v1233_v28 = vadd.f32 1.0, %v2393_v22  ;;  %v2395_v31 = vpop.eup %2394 }
 0x505   :  { %2396 = vrcp.f32 %v1233_v28 }
 0x506   :  { %2398 = vtanh.f32 %v2297_v23 }
 0x50f   :  { %v2397_v34 = vpop.eup %2396 }
 0x510   :  { %v1236_v35 = vsub.f32 1.0, %v2397_v34  ;;  %v1238_v36 = vmul.f32 %v2397_v34, %v2395_v31  ;;  %v2399_v39 = vpop.eup %2398 }
 0x512   :  { %v1237_v42 = vmul.f32 %v2399_v39, %v1236_v35 }
 0x514   :  { %v1239_v47 = vadd.f32 %v1238_v36, %v1237_v42 }
 0x516   :  { %1312 = vmatmul.mubr.f32.vlgmr.msra.gmra.mrb[10].mxu0 %v1239_v47  ;;  %1383 = vmatmul.mubr.f32.vlgmr.msra.gmra.mrb[10].mxu1 %v1239_v47 }
 0x517   :  { %2164 = vmatpush1.bf16.msra.mxu0 %v2531_v14  ;;  %2196 = vmatpush1.bf16.msra.mxu1 %v2535_v17 }
 0x518   :  { %2166 = vmatprep.subr.bf16.mxu0 %v2544_v25  ;;  %2198 = vmatprep.subr.bf16.mxu1 %v2546_v26 }
 0x519   :  { %1473 = vmatprep.mubr.f32.mxu0 %v2475_v0  ;;  %1544 = vmatprep.mubr.f32.mxu1 %v2475_v0 }
 0x51b   :  { %2168 = vmatpush1.bf16.msra.mxu0 %v2550_v29  ;;  %2200 = vmatpush1.bf16.msra.mxu1 %v2552_v30 }
 0x51c   :  { %2170 = vmatprep.subr.bf16.mxu0 %v2563_v40  ;;  %2202 = vmatprep.subr.bf16.mxu1 %v2565_v41 }
 0x51f   :  { %2172 = vmatpush1.bf16.msra.mxu0 %v2569_v44  ;;  %2204 = vmatpush1.bf16.msra.mxu1 %v2571_v45 }
 0x520   :  { %2174 = vmatprep.subr.bf16.mxu0 %v2582_v53  ;;  %2206 = vmatprep.subr.bf16.mxu1 %v2584_v54 }
 0x523   :  { %2176 = vmatpush1.bf16.msra.mxu0 %v2588_v57  ;;  %2208 = vmatpush1.bf16.msra.mxu1 %v2590_v58 }
 0x524   :  { %2178 = vmatprep.subr.bf16.mxu0 %v2601_v3  ;;  %2210 = vmatprep.subr.bf16.mxu1 %v2603_v4 }
 0x527   :  { %2180 = vmatpush1.bf16.msra.mxu0 %v2607_v7  ;;  %2212 = vmatpush1.bf16.msra.mxu1 %v2609_v8 }
 0x528   :  { %2182 = vmatprep.subr.bf16.mxu0 %v2620_v20  ;;  %2214 = vmatprep.subr.bf16.mxu1 %v2622_v21 }
 0x52b   :  { %2184 = vmatpush1.bf16.msra.mxu0 %v2626_v24  ;;  %2216 = vmatpush1.bf16.msra.mxu1 %v2628_v27 }
 0x52c   :  { %2186 = vmatprep.subr.bf16.mxu0 %v2639_v37  ;;  %2218 = vmatprep.subr.bf16.mxu1 %v2641_v38 }
 0x52f   :  { %2188 = vmatpush1.bf16.msra.mxu0 %v2645_v43  ;;  %2220 = vmatpush1.bf16.msra.mxu1 %v2647_v46 }
 0x530   :  { %2190 = vmatprep.subr.bf16.mxu0 %v2658_v56  ;;  %2222 = vmatprep.subr.bf16.mxu1 %v2660_v59 }
 0x533   :  { %2192 = vmatpush1.bf16.msra.mxu0 %v2664_v60  ;;  %2224 = vmatpush1.bf16.msra.mxu1 %v2666_v61 }
 0x534   :  { %2226 = vmatprep.subr.bf16.mxu0 %v2525_v9  ;;  %2258 = vmatprep.subr.bf16.mxu1 %v2529_v13 }
 0x5e9   :  { %v1313_v48 = vpop.f32.mrb[10].mxu0  ;;  %v1384_v49 = vpop.f32.mrb[10].mxu1 }
 0x5ea   :  { %v2315_v50 = vadd.f32 %v1384_v49, %v2719_v6  ;;  %v1315_v51 = vpop.f32.mrb[11].mxu0  ;;  %v1386_v52 = vpop.f32.mrb[11].mxu1  ;;  %v2299_v5 = vadd.f32 %v1313_v48, %v2727_v33 }
 0x5eb   :  { %v2316_v55 = vadd.f32 %v1386_v52, %v2721_v10  ;;  %v2300_v1 = vadd.f32 %v1315_v51, %v2725_v32 }
 0x5ed   :  { %v1391_v62 = vadd.f32 %v2316_v55, %v2315_v50 }
 0x5ef   :  { %v1774_v63 = vmul.f32 -1.442695, %v1391_v62 }
 0x5f1   :  { %2400 = vpow2.f32 %v1774_v63 }
 0x5f2   :  { %2402 = vtanh.f32 %v2300_v1 }
 0x5fb   :  { %v2401_v2 = vpop.eup %2400 }
 0x5fc   :  { %v1395_v11 = vadd.f32 1.0, %v2401_v2  ;;  %v2403_v9 = vpop.eup %2402 }
 0x5fe   :  { %2404 = vrcp.f32 %v1395_v11 }
 0x5ff   :  { %2406 = vtanh.f32 %v2299_v5 }
 0x608   :  { %v2405_v13 = vpop.eup %2404 }
 0x609   :  { %v1398_v12 = vsub.f32 1.0, %v2405_v13  ;;  %v1400_v15 = vmul.f32 %v2405_v13, %v2403_v9  ;;  %v2407_v16 = vpop.eup %2406 }
 0x60b   :  { %v1399_v18 = vmul.f32 %v2407_v16, %v1398_v12 }
 0x60d   :  { %v1401_v19 = vadd.f32 %v1400_v15, %v1399_v18 }
 0x60f   :  { %1474 = vmatmul.mubr.f32.vlgmr.msra.gmra.mrb[12].mxu0 %v1401_v19  ;;  %1545 = vmatmul.mubr.f32.vlgmr.msra.gmra.mrb[12].mxu1 %v1401_v19 }
 0x610   :  { %2228 = vmatpush1.bf16.msra.mxu0 %v2531_v14  ;;  %2260 = vmatpush1.bf16.msra.mxu1 %v2535_v17 }
 0x611   :  { %2230 = vmatprep.subr.bf16.mxu0 %v2544_v25  ;;  %2262 = vmatprep.subr.bf16.mxu1 %v2546_v26 }
 0x612   :  { %1635 = vmatprep.mubr.f32.mxu0 %v2475_v0  ;;  %1706 = vmatprep.mubr.f32.mxu1 %v2475_v0 }
 0x614   :  { %2232 = vmatpush1.bf16.msra.mxu0 %v2550_v29  ;;  %2264 = vmatpush1.bf16.msra.mxu1 %v2552_v30 }
 0x615   :  { %2234 = vmatprep.subr.bf16.mxu0 %v2563_v40  ;;  %2266 = vmatprep.subr.bf16.mxu1 %v2565_v41 }
 0x618   :  { %2236 = vmatpush1.bf16.msra.mxu0 %v2569_v44  ;;  %2268 = vmatpush1.bf16.msra.mxu1 %v2571_v45 }
 0x619   :  { %2238 = vmatprep.subr.bf16.mxu0 %v2582_v53  ;;  %2270 = vmatprep.subr.bf16.mxu1 %v2584_v54 }
 0x61c   :  { %2240 = vmatpush1.bf16.msra.mxu0 %v2588_v57  ;;  %2272 = vmatpush1.bf16.msra.mxu1 %v2590_v58 }
 0x61d   :  { %2242 = vmatprep.subr.bf16.mxu0 %v2601_v3  ;;  %2274 = vmatprep.subr.bf16.mxu1 %v2603_v4 }
 0x620   :  { %2244 = vmatpush1.bf16.msra.mxu0 %v2607_v7  ;;  %2276 = vmatpush1.bf16.msra.mxu1 %v2609_v8 }
 0x621   :  { %2246 = vmatprep.subr.bf16.mxu0 %v2620_v20  ;;  %2278 = vmatprep.subr.bf16.mxu1 %v2622_v21 }
 0x624   :  { %2248 = vmatpush1.bf16.msra.mxu0 %v2626_v24  ;;  %2280 = vmatpush1.bf16.msra.mxu1 %v2628_v27 }
 0x625   :  { %2250 = vmatprep.subr.bf16.mxu0 %v2639_v37  ;;  %2282 = vmatprep.subr.bf16.mxu1 %v2641_v38 }
 0x628   :  { %2252 = vmatpush1.bf16.msra.mxu0 %v2645_v43  ;;  %2284 = vmatpush1.bf16.msra.mxu1 %v2647_v46 }
 0x629   :  { %2254 = vmatprep.subr.bf16.mxu0 %v2658_v56  ;;  %2286 = vmatprep.subr.bf16.mxu1 %v2660_v59 }
 0x62c   :  { %2256 = vmatpush1.bf16.msra.mxu0 %v2664_v60  ;;  %2288 = vmatpush1.bf16.msra.mxu1 %v2666_v61 }
 0x6e2   :  { %v1475_v0 = vpop.f32.mrb[12].mxu0  ;;  %v1546_v14 = vpop.f32.mrb[12].mxu1 }
 0x6e3   :  { %v2317_v17 = vadd.f32 %v1546_v14, %v2719_v6  ;;  %v1477_v25 = vpop.f32.mrb[13].mxu0  ;;  %v1548_v26 = vpop.f32.mrb[13].mxu1  ;;  %v2301_v45 = vadd.f32 %v1475_v0, %v2727_v33 }
 0x6e4   :  { %v2318_v29 = vadd.f32 %v1548_v26, %v2721_v10  ;;  %v2302_v41 = vadd.f32 %v1477_v25, %v2725_v32 }
 0x6e6   :  { %v1553_v30 = vadd.f32 %v2318_v29, %v2317_v17 }
 0x6e8   :  { %v1775_v40 = vmul.f32 -1.442695, %v1553_v30 }
 0x6ea   :  { %2408 = vpow2.f32 %v1775_v40 }
 0x6eb   :  { %2410 = vtanh.f32 %v2302_v41 }
 0x6f4   :  { %v2409_v44 = vpop.eup %2408 }
 0x6f5   :  { %v1557_v53 = vadd.f32 1.0, %v2409_v44  ;;  %v2411_v54 = vpop.eup %2410 }
 0x6f7   :  { %2412 = vrcp.f32 %v1557_v53 }
 0x6f8   :  { %2414 = vtanh.f32 %v2301_v45 }
 0x701   :  { %v2413_v57 = vpop.eup %2412 }
 0x702   :  { %v1560_v58 = vsub.f32 1.0, %v2413_v57  ;;  %v1562_v3 = vmul.f32 %v2413_v57, %v2411_v54  ;;  %v2415_v4 = vpop.eup %2414 }
 0x704   :  { %v1561_v7 = vmul.f32 %v2415_v4, %v1560_v58 }
 0x706   :  { %v1563_v8 = vadd.f32 %v1562_v3, %v1561_v7 }
 0x708   :  { %1636 = vmatmul.mubr.f32.vlgmr.msra.gmra.mrb[14].mxu0 %v1563_v8  ;;  %1707 = vmatmul.mubr.f32.vlgmr.msra.gmra.mrb[14].mxu1 %v1563_v8 }
 0x7db   :  { %v1637_v20 = vpop.f32.mrb[14].mxu0  ;;  %v1708_v21 = vpop.f32.mrb[14].mxu1 }
 0x7dc   :  { %v2319_v24 = vadd.f32 %v1708_v21, %v2719_v6  ;;  %v1639_v27 = vpop.f32.mrb[15].mxu0  ;;  %v1710_v37 = vpop.f32.mrb[15].mxu1  ;;  %v2303_v60 = vadd.f32 %v1637_v20, %v2727_v33 }
 0x7dd   :  { %v2320_v38 = vadd.f32 %v1710_v37, %v2721_v10  ;;  %v2304_v56 = vadd.f32 %v1639_v27, %v2725_v32 }
 0x7df   :  { %v1715_v43 = vadd.f32 %v2320_v38, %v2319_v24 }
 0x7e1   :  { %v1776_v46 = vmul.f32 -1.442695, %v1715_v43 }
 0x7e3   :  { %2416 = vpow2.f32 %v1776_v46 }
 0x7e4   :  { %2418 = vtanh.f32 %v2304_v56 }
 0x7ed   :  { %v2417_v59 = vpop.eup %2416 }
 0x7ee   :  { %v1719_v61 = vadd.f32 1.0, %v2417_v59  ;;  %v2419_v22 = vpop.eup %2418 }
 0x7f0   :  { %2420 = vrcp.f32 %v1719_v61 }
 0x7f1   :  { %2422 = vtanh.f32 %v2303_v60 }
 0x7fa   :  { %v2421_v23 = vpop.eup %2420 }
 0x7fb   :  { %v1722_v28 = vsub.f32 1.0, %v2421_v23  ;;  %v1724_v6 = vmul.f32 %v2421_v23, %v2419_v22  ;;  %v2423_v31 = vpop.eup %2422 }
 0x7fd   :  { %v1723_v10 = vmul.f32 %v2423_v31, %v1722_v28 }
 0x7ff   :  { %v1725_v34 = vadd.f32 %v1724_v6, %v1723_v10 }
 0x801   :  { %1726 = vst [vmem:[#allocation6] sm:$0xff] %v1725_v34 }
 0x802   :  { %2457 = shalt.err (!%p2454_p12)
}
 0x803   :  { %s2458_s26 = scalar_lea.hbm %s2977_s4, 128 }
 0x804   :  { %p2459_p13 = scmp.ne.s32.totalorder %s2977_s4, %s2458_s26  ;;  %p2462_p0 = scmp.lt.u32.totalorder %s2458_s26, %s2977_s4 }
 0x806   :  { %p2464_p1 = pnand %p2462_p0, %p2459_p13 }
 0x808   :  { %2467 = shalt.err (!%p2464_p1)
}
 0x809   :  { %1736 = dma.vmem_to_hbm [thread:$0]  %s1734_s22, 128, %s2977_s4, [#allocation5]  }
 0x80a   :  { %2470 = dma.done.wait [#allocation5], 128  }
 0x80b   :  { %2471 = vsyncadd [#allocation5], 4294967168 }
 0x80c   :  { %1740 = vsyncpa [#allocation4], 1 }
 0x80d   :  { %1741 = vsyncpa [#allocation5], 1 }

</bundles_post_ra>
